<compile_context>
chip_gen: v7x
topology: tpu7x:2x2x1
jax: 0.10.0
libtpu: 0.0.40
codegen_flags: <defaults>
</compile_context>

<pallas_src>
import functools

import jax
import jax.numpy as jnp
from jax.experimental import pallas as pl
from jax.experimental.pallas import tpu as pltpu

FEAT = 3          # true feature dim of the INN (3 -> 3 -> 3 -> 3 -> 3)
SLOPE = 0.03      # leaky-relu slope
N_LAYERS = 4
LANE = 128        # TPU lane width


def _inn_kernel(ws_ref, bs_ref, x_ref, o_ref):
    """ws_ref: (36,) f32 SMEM, bs_ref: (12,) f32 SMEM,
    x_ref / o_ref: (3, TBS, 128) f32 VMEM (feature-major, batch on sublanes+lanes)."""
    h0 = x_ref[0]          # (TBS, 128) — fully dense vregs
    h1 = x_ref[1]
    h2 = x_ref[2]
    for layer in range(N_LAYERS):
        wo = layer * 9     # ws flat layout: w[layer, k, j] at wo + k*3 + j
        bo = layer * 3
        # y_j = sum_k w[k, j] * h_k + b_j  — scalar (SMEM) x vector (VMEM) mul-adds.
        y0 = ws_ref[wo + 0] * h0 + ws_ref[wo + 3] * h1 + ws_ref[wo + 6] * h2 + bs_ref[bo + 0]
        y1 = ws_ref[wo + 1] * h0 + ws_ref[wo + 4] * h1 + ws_ref[wo + 7] * h2 + bs_ref[bo + 1]
        y2 = ws_ref[wo + 2] * h0 + ws_ref[wo + 5] * h1 + ws_ref[wo + 8] * h2 + bs_ref[bo + 2]
        if layer < N_LAYERS - 1:
            # leaky-relu: max(y, slope*y) == where(y>0, y, slope*y) for 0<slope<1.
            y0 = jnp.maximum(y0, y0 * SLOPE)
            y1 = jnp.maximum(y1, y1 * SLOPE)
            y2 = jnp.maximum(y2, y2 * SLOPE)
        h0, h1, h2 = y0, y1, y2
    o_ref[0] = h0
    o_ref[1] = h1
    o_ref[2] = h2


def prepare_params(params):
    """Hoisted, once-per-model packing of the eight small parameters (flattened 1-D)."""
    w_flat = jnp.stack(
        [params[f"w{i}"] for i in (1, 2, 3, 4)]).astype(jnp.float32).reshape(-1)   # (36,)
    b_flat = jnp.stack(
        [params[f"b{i}"] for i in (1, 2, 3, 4)]).astype(jnp.float32).reshape(-1)   # (12,)
    return w_flat, b_flat


def _round_up(n, m):
    return ((n + m - 1) // m) * m


@functools.partial(jax.jit, static_argnames=("block_rows",))
def inn_forward(x, w_flat, b_flat, *, block_rows=2048):
    """x: (batch, 3) float32; w_flat/b_flat: flattened params from prepare_params().

    block_rows = sublane rows per tile; each tile covers block_rows * 128 batch rows
    (default 2048 -> 256K rows, 3 MiB of x per tile).
    """
    batch, feat = x.shape
    assert feat == FEAT
    x = x.astype(jnp.float32)

    # Lane-dense layout: (batch, 3) -> (3, padded_batch) -> (3, NB, 128).
    padded = _round_up(max(batch, 1), LANE)
    nb = padded // LANE
    xt = jnp.transpose(x, (1, 0))
    if padded != batch:
        xt = jnp.pad(xt, ((0, 0), (0, padded - batch)))
    x3 = xt.reshape(FEAT, nb, LANE)

    # Sublane tile size: multiple of 8, or the full (small) sublane extent.
    tbs = min(block_rows, nb)
    if tbs < nb:
        tbs = max(8, (tbs // 8) * 8)
    grid = (pl.cdiv(nb, tbs),)

    out3 = pl.pallas_call(
        _inn_kernel,
        out_shape=jax.ShapeDtypeStruct((FEAT, nb, LANE), jnp.float32),
        grid=grid,
        in_specs=[
            # 36 weights + 12 biases as scalars in SMEM (resident, no tiling).
            pl.BlockSpec(memory_space=pltpu.MemorySpace.SMEM),
            pl.BlockSpec(memory_space=pltpu.MemorySpace.SMEM),
            # x: batch-tiled along sublanes; lanes always full (128-wide).
            pl.BlockSpec((FEAT, tbs, LANE), lambda i: (0, i, 0)),
        ],
        out_specs=pl.BlockSpec((FEAT, tbs, LANE), lambda i: (0, i, 0)),
        compiler_params=pltpu.CompilerParams(
            dimension_semantics=("parallel",),
            vmem_limit_bytes=32 * 1024 * 1024,
        ),
    )(w_flat, b_flat, x3)

    # Back to the caller's (batch, 3) layout.
    y = out3.reshape(FEAT, padded)[:, :batch]
    return jnp.transpose(y, (1, 0))


def inn_forward_ref(x, params):
    """Plain-JAX reference matching the PyTorch forward exactly (full f32 precision)."""
    hp = jax.lax.Precision.HIGHEST

    def lrelu(v):
        return jnp.where(v > 0, v, v * SLOPE)

    l1 = lrelu(jnp.matmul(x, params["w1"], precision=hp) + params["b1"])
    l2 = lrelu(jnp.matmul(l1, params["w2"], precision=hp) + params["b2"])
    l3 = lrelu(jnp.matmul(l2, params["w3"], precision=hp) + params["b3"])
    return jnp.matmul(l3, params["w4"], precision=hp) + params["b4"]


def init_params(key):
    ks = jax.random.split(key, 8)
    p = {}
    for i in range(4):
        p[f"w{i+1}"] = jax.random.normal(ks[2 * i], (FEAT, FEAT), jnp.float32)
        p[f"b{i+1}"] = jax.random.normal(ks[2 * i + 1], (1, FEAT), jnp.float32)
    return p


if __name__ == "__main__":
    key = jax.random.PRNGKey(0)
    pkey, xkey = jax.random.split(key)
    params = init_params(pkey)
    w_flat, b_flat = prepare_params(params)   # hoisted: packed once per model

    batch = 8
    x = jax.random.normal(xkey, (batch, FEAT), jnp.float32)

    y = jax.block_until_ready(inn_forward(x, w_flat, b_flat))

    y_ref = inn_forward_ref(x, params)
    assert y.shape == (batch, FEAT)
    assert jnp.allclose(y, y_ref, atol=1e-4, rtol=1e-4), "mismatch vs reference"

    print("KERNEL_OK")
</pallas_src>

<mosaic_0001>
module attributes {stable_mosaic.version = 11 : i64} {
  func.func @_inn_kernel(%arg0: i32, %arg1: memref<36xf32, #tpu.memory_space<smem>>, %arg2: memref<12xf32, #tpu.memory_space<smem>>, %arg3: memref<3x1x128xf32, #tpu.memory_space<vmem>>, %arg4: memref<3x1x128xf32, #tpu.memory_space<vmem>>) attributes {dimension_semantics = [#tpu.dimension_semantics<parallel>], iteration_bounds = array<i64: 1>, scalar_prefetch = 0 : i64, scratch_operands = 0 : i64, tpu.core_type = #tpu.core_type<tc>, window_params = [{transform_indices = @transform_0, window_bounds = array<i64: 36>}, {transform_indices = @transform_1, window_bounds = array<i64: 12>}, {transform_indices = @transform_2, window_bounds = array<i64: 3, 1, 128>}, {transform_indices = @transform_3, window_bounds = array<i64: 3, 1, 128>}]} {
    %c0 = arith.constant 0 : index
    %c0_0 = arith.constant 0 : index
    %c0_1 = arith.constant 0 : index
    %0 = vector.load %arg3[%c0, %c0_0, %c0_1] : memref<3x1x128xf32, #tpu.memory_space<vmem>>, vector<1x1x128xf32>
    %1 = vector.shape_cast %0 : vector<1x1x128xf32> to vector<1x128xf32>
    %c1 = arith.constant 1 : index
    %c0_2 = arith.constant 0 : index
    %c0_3 = arith.constant 0 : index
    %2 = vector.load %arg3[%c1, %c0_2, %c0_3] : memref<3x1x128xf32, #tpu.memory_space<vmem>>, vector<1x1x128xf32>
    %3 = vector.shape_cast %2 : vector<1x1x128xf32> to vector<1x128xf32>
    %c2 = arith.constant 2 : index
    %c0_4 = arith.constant 0 : index
    %c0_5 = arith.constant 0 : index
    %4 = vector.load %arg3[%c2, %c0_4, %c0_5] : memref<3x1x128xf32, #tpu.memory_space<vmem>>, vector<1x1x128xf32>
    %5 = vector.shape_cast %4 : vector<1x1x128xf32> to vector<1x128xf32>
    %c0_6 = arith.constant 0 : index
    %6 = memref.load %arg1[%c0_6] : memref<36xf32, #tpu.memory_space<smem>>
    %7 = vector.broadcast %6 : f32 to vector<1x128xf32>
    %8 = arith.mulf %7, %1 : vector<1x128xf32>
    %c3 = arith.constant 3 : index
    %9 = memref.load %arg1[%c3] : memref<36xf32, #tpu.memory_space<smem>>
    %10 = vector.broadcast %9 : f32 to vector<1x128xf32>
    %11 = arith.mulf %10, %3 : vector<1x128xf32>
    %12 = arith.addf %8, %11 : vector<1x128xf32>
    %c6 = arith.constant 6 : index
    %13 = memref.load %arg1[%c6] : memref<36xf32, #tpu.memory_space<smem>>
    %14 = vector.broadcast %13 : f32 to vector<1x128xf32>
    %15 = arith.mulf %14, %5 : vector<1x128xf32>
    %16 = arith.addf %12, %15 : vector<1x128xf32>
    %c0_7 = arith.constant 0 : index
    %17 = memref.load %arg2[%c0_7] : memref<12xf32, #tpu.memory_space<smem>>
    %18 = vector.broadcast %17 : f32 to vector<1x128xf32>
    %19 = arith.addf %16, %18 : vector<1x128xf32>
    %c1_8 = arith.constant 1 : index
    %20 = memref.load %arg1[%c1_8] : memref<36xf32, #tpu.memory_space<smem>>
    %21 = vector.broadcast %20 : f32 to vector<1x128xf32>
    %22 = arith.mulf %21, %1 : vector<1x128xf32>
    %c4 = arith.constant 4 : index
    %23 = memref.load %arg1[%c4] : memref<36xf32, #tpu.memory_space<smem>>
    %24 = vector.broadcast %23 : f32 to vector<1x128xf32>
    %25 = arith.mulf %24, %3 : vector<1x128xf32>
    %26 = arith.addf %22, %25 : vector<1x128xf32>
    %c7 = arith.constant 7 : index
    %27 = memref.load %arg1[%c7] : memref<36xf32, #tpu.memory_space<smem>>
    %28 = vector.broadcast %27 : f32 to vector<1x128xf32>
    %29 = arith.mulf %28, %5 : vector<1x128xf32>
    %30 = arith.addf %26, %29 : vector<1x128xf32>
    %c1_9 = arith.constant 1 : index
    %31 = memref.load %arg2[%c1_9] : memref<12xf32, #tpu.memory_space<smem>>
    %32 = vector.broadcast %31 : f32 to vector<1x128xf32>
    %33 = arith.addf %30, %32 : vector<1x128xf32>
    %c2_10 = arith.constant 2 : index
    %34 = memref.load %arg1[%c2_10] : memref<36xf32, #tpu.memory_space<smem>>
    %35 = vector.broadcast %34 : f32 to vector<1x128xf32>
    %36 = arith.mulf %35, %1 : vector<1x128xf32>
    %c5 = arith.constant 5 : index
    %37 = memref.load %arg1[%c5] : memref<36xf32, #tpu.memory_space<smem>>
    %38 = vector.broadcast %37 : f32 to vector<1x128xf32>
    %39 = arith.mulf %38, %3 : vector<1x128xf32>
    %40 = arith.addf %36, %39 : vector<1x128xf32>
    %c8 = arith.constant 8 : index
    %41 = memref.load %arg1[%c8] : memref<36xf32, #tpu.memory_space<smem>>
    %42 = vector.broadcast %41 : f32 to vector<1x128xf32>
    %43 = arith.mulf %42, %5 : vector<1x128xf32>
    %44 = arith.addf %40, %43 : vector<1x128xf32>
    %c2_11 = arith.constant 2 : index
    %45 = memref.load %arg2[%c2_11] : memref<12xf32, #tpu.memory_space<smem>>
    %46 = vector.broadcast %45 : f32 to vector<1x128xf32>
    %47 = arith.addf %44, %46 : vector<1x128xf32>
    %cst = arith.constant 3.000000e-02 : f32
    %48 = vector.broadcast %cst : f32 to vector<1x128xf32>
    %49 = arith.mulf %19, %48 : vector<1x128xf32>
    %50 = arith.maximumf %19, %49 : vector<1x128xf32>
    %cst_12 = arith.constant 3.000000e-02 : f32
    %51 = vector.broadcast %cst_12 : f32 to vector<1x128xf32>
    %52 = arith.mulf %33, %51 : vector<1x128xf32>
    %53 = arith.maximumf %33, %52 : vector<1x128xf32>
    %cst_13 = arith.constant 3.000000e-02 : f32
    %54 = vector.broadcast %cst_13 : f32 to vector<1x128xf32>
    %55 = arith.mulf %47, %54 : vector<1x128xf32>
    %56 = arith.maximumf %47, %55 : vector<1x128xf32>
    %c9 = arith.constant 9 : index
    %57 = memref.load %arg1[%c9] : memref<36xf32, #tpu.memory_space<smem>>
    %58 = vector.broadcast %57 : f32 to vector<1x128xf32>
    %59 = arith.mulf %58, %50 : vector<1x128xf32>
    %c12 = arith.constant 12 : index
    %60 = memref.load %arg1[%c12] : memref<36xf32, #tpu.memory_space<smem>>
    %61 = vector.broadcast %60 : f32 to vector<1x128xf32>
    %62 = arith.mulf %61, %53 : vector<1x128xf32>
    %63 = arith.addf %59, %62 : vector<1x128xf32>
    %c15 = arith.constant 15 : index
    %64 = memref.load %arg1[%c15] : memref<36xf32, #tpu.memory_space<smem>>
    %65 = vector.broadcast %64 : f32 to vector<1x128xf32>
    %66 = arith.mulf %65, %56 : vector<1x128xf32>
    %67 = arith.addf %63, %66 : vector<1x128xf32>
    %c3_14 = arith.constant 3 : index
    %68 = memref.load %arg2[%c3_14] : memref<12xf32, #tpu.memory_space<smem>>
    %69 = vector.broadcast %68 : f32 to vector<1x128xf32>
    %70 = arith.addf %67, %69 : vector<1x128xf32>
    %c10 = arith.constant 10 : index
    %71 = memref.load %arg1[%c10] : memref<36xf32, #tpu.memory_space<smem>>
    %72 = vector.broadcast %71 : f32 to vector<1x128xf32>
    %73 = arith.mulf %72, %50 : vector<1x128xf32>
    %c13 = arith.constant 13 : index
    %74 = memref.load %arg1[%c13] : memref<36xf32, #tpu.memory_space<smem>>
    %75 = vector.broadcast %74 : f32 to vector<1x128xf32>
    %76 = arith.mulf %75, %53 : vector<1x128xf32>
    %77 = arith.addf %73, %76 : vector<1x128xf32>
    %c16 = arith.constant 16 : index
    %78 = memref.load %arg1[%c16] : memref<36xf32, #tpu.memory_space<smem>>
    %79 = vector.broadcast %78 : f32 to vector<1x128xf32>
    %80 = arith.mulf %79, %56 : vector<1x128xf32>
    %81 = arith.addf %77, %80 : vector<1x128xf32>
    %c4_15 = arith.constant 4 : index
    %82 = memref.load %arg2[%c4_15] : memref<12xf32, #tpu.memory_space<smem>>
    %83 = vector.broadcast %82 : f32 to vector<1x128xf32>
    %84 = arith.addf %81, %83 : vector<1x128xf32>
    %c11 = arith.constant 11 : index
    %85 = memref.load %arg1[%c11] : memref<36xf32, #tpu.memory_space<smem>>
    %86 = vector.broadcast %85 : f32 to vector<1x128xf32>
    %87 = arith.mulf %86, %50 : vector<1x128xf32>
    %c14 = arith.constant 14 : index
    %88 = memref.load %arg1[%c14] : memref<36xf32, #tpu.memory_space<smem>>
    %89 = vector.broadcast %88 : f32 to vector<1x128xf32>
    %90 = arith.mulf %89, %53 : vector<1x128xf32>
    %91 = arith.addf %87, %90 : vector<1x128xf32>
    %c17 = arith.constant 17 : index
    %92 = memref.load %arg1[%c17] : memref<36xf32, #tpu.memory_space<smem>>
    %93 = vector.broadcast %92 : f32 to vector<1x128xf32>
    %94 = arith.mulf %93, %56 : vector<1x128xf32>
    %95 = arith.addf %91, %94 : vector<1x128xf32>
    %c5_16 = arith.constant 5 : index
    %96 = memref.load %arg2[%c5_16] : memref<12xf32, #tpu.memory_space<smem>>
    %97 = vector.broadcast %96 : f32 to vector<1x128xf32>
    %98 = arith.addf %95, %97 : vector<1x128xf32>
    %cst_17 = arith.constant 3.000000e-02 : f32
    %99 = vector.broadcast %cst_17 : f32 to vector<1x128xf32>
    %100 = arith.mulf %70, %99 : vector<1x128xf32>
    %101 = arith.maximumf %70, %100 : vector<1x128xf32>
    %cst_18 = arith.constant 3.000000e-02 : f32
    %102 = vector.broadcast %cst_18 : f32 to vector<1x128xf32>
    %103 = arith.mulf %84, %102 : vector<1x128xf32>
    %104 = arith.maximumf %84, %103 : vector<1x128xf32>
    %cst_19 = arith.constant 3.000000e-02 : f32
    %105 = vector.broadcast %cst_19 : f32 to vector<1x128xf32>
    %106 = arith.mulf %98, %105 : vector<1x128xf32>
    %107 = arith.maximumf %98, %106 : vector<1x128xf32>
    %c18 = arith.constant 18 : index
    %108 = memref.load %arg1[%c18] : memref<36xf32, #tpu.memory_space<smem>>
    %109 = vector.broadcast %108 : f32 to vector<1x128xf32>
    %110 = arith.mulf %109, %101 : vector<1x128xf32>
    %c21 = arith.constant 21 : index
    %111 = memref.load %arg1[%c21] : memref<36xf32, #tpu.memory_space<smem>>
    %112 = vector.broadcast %111 : f32 to vector<1x128xf32>
    %113 = arith.mulf %112, %104 : vector<1x128xf32>
    %114 = arith.addf %110, %113 : vector<1x128xf32>
    %c24 = arith.constant 24 : index
    %115 = memref.load %arg1[%c24] : memref<36xf32, #tpu.memory_space<smem>>
    %116 = vector.broadcast %115 : f32 to vector<1x128xf32>
    %117 = arith.mulf %116, %107 : vector<1x128xf32>
    %118 = arith.addf %114, %117 : vector<1x128xf32>
    %c6_20 = arith.constant 6 : index
    %119 = memref.load %arg2[%c6_20] : memref<12xf32, #tpu.memory_space<smem>>
    %120 = vector.broadcast %119 : f32 to vector<1x128xf32>
    %121 = arith.addf %118, %120 : vector<1x128xf32>
    %c19 = arith.constant 19 : index
    %122 = memref.load %arg1[%c19] : memref<36xf32, #tpu.memory_space<smem>>
    %123 = vector.broadcast %122 : f32 to vector<1x128xf32>
    %124 = arith.mulf %123, %101 : vector<1x128xf32>
    %c22 = arith.constant 22 : index
    %125 = memref.load %arg1[%c22] : memref<36xf32, #tpu.memory_space<smem>>
    %126 = vector.broadcast %125 : f32 to vector<1x128xf32>
    %127 = arith.mulf %126, %104 : vector<1x128xf32>
    %128 = arith.addf %124, %127 : vector<1x128xf32>
    %c25 = arith.constant 25 : index
    %129 = memref.load %arg1[%c25] : memref<36xf32, #tpu.memory_space<smem>>
    %130 = vector.broadcast %129 : f32 to vector<1x128xf32>
    %131 = arith.mulf %130, %107 : vector<1x128xf32>
    %132 = arith.addf %128, %131 : vector<1x128xf32>
    %c7_21 = arith.constant 7 : index
    %133 = memref.load %arg2[%c7_21] : memref<12xf32, #tpu.memory_space<smem>>
    %134 = vector.broadcast %133 : f32 to vector<1x128xf32>
    %135 = arith.addf %132, %134 : vector<1x128xf32>
    %c20 = arith.constant 20 : index
    %136 = memref.load %arg1[%c20] : memref<36xf32, #tpu.memory_space<smem>>
    %137 = vector.broadcast %136 : f32 to vector<1x128xf32>
    %138 = arith.mulf %137, %101 : vector<1x128xf32>
    %c23 = arith.constant 23 : index
    %139 = memref.load %arg1[%c23] : memref<36xf32, #tpu.memory_space<smem>>
    %140 = vector.broadcast %139 : f32 to vector<1x128xf32>
    %141 = arith.mulf %140, %104 : vector<1x128xf32>
    %142 = arith.addf %138, %141 : vector<1x128xf32>
    %c26 = arith.constant 26 : index
    %143 = memref.load %arg1[%c26] : memref<36xf32, #tpu.memory_space<smem>>
    %144 = vector.broadcast %143 : f32 to vector<1x128xf32>
    %145 = arith.mulf %144, %107 : vector<1x128xf32>
    %146 = arith.addf %142, %145 : vector<1x128xf32>
    %c8_22 = arith.constant 8 : index
    %147 = memref.load %arg2[%c8_22] : memref<12xf32, #tpu.memory_space<smem>>
    %148 = vector.broadcast %147 : f32 to vector<1x128xf32>
    %149 = arith.addf %146, %148 : vector<1x128xf32>
    %cst_23 = arith.constant 3.000000e-02 : f32
    %150 = vector.broadcast %cst_23 : f32 to vector<1x128xf32>
    %151 = arith.mulf %121, %150 : vector<1x128xf32>
    %152 = arith.maximumf %121, %151 : vector<1x128xf32>
    %cst_24 = arith.constant 3.000000e-02 : f32
    %153 = vector.broadcast %cst_24 : f32 to vector<1x128xf32>
    %154 = arith.mulf %135, %153 : vector<1x128xf32>
    %155 = arith.maximumf %135, %154 : vector<1x128xf32>
    %cst_25 = arith.constant 3.000000e-02 : f32
    %156 = vector.broadcast %cst_25 : f32 to vector<1x128xf32>
    %157 = arith.mulf %149, %156 : vector<1x128xf32>
    %158 = arith.maximumf %149, %157 : vector<1x128xf32>
    %c27 = arith.constant 27 : index
    %159 = memref.load %arg1[%c27] : memref<36xf32, #tpu.memory_space<smem>>
    %160 = vector.broadcast %159 : f32 to vector<1x128xf32>
    %161 = arith.mulf %160, %152 : vector<1x128xf32>
    %c30 = arith.constant 30 : index
    %162 = memref.load %arg1[%c30] : memref<36xf32, #tpu.memory_space<smem>>
    %163 = vector.broadcast %162 : f32 to vector<1x128xf32>
    %164 = arith.mulf %163, %155 : vector<1x128xf32>
    %165 = arith.addf %161, %164 : vector<1x128xf32>
    %c33 = arith.constant 33 : index
    %166 = memref.load %arg1[%c33] : memref<36xf32, #tpu.memory_space<smem>>
    %167 = vector.broadcast %166 : f32 to vector<1x128xf32>
    %168 = arith.mulf %167, %158 : vector<1x128xf32>
    %169 = arith.addf %165, %168 : vector<1x128xf32>
    %c9_26 = arith.constant 9 : index
    %170 = memref.load %arg2[%c9_26] : memref<12xf32, #tpu.memory_space<smem>>
    %171 = vector.broadcast %170 : f32 to vector<1x128xf32>
    %172 = arith.addf %169, %171 : vector<1x128xf32>
    %c28 = arith.constant 28 : index
    %173 = memref.load %arg1[%c28] : memref<36xf32, #tpu.memory_space<smem>>
    %174 = vector.broadcast %173 : f32 to vector<1x128xf32>
    %175 = arith.mulf %174, %152 : vector<1x128xf32>
    %c31 = arith.constant 31 : index
    %176 = memref.load %arg1[%c31] : memref<36xf32, #tpu.memory_space<smem>>
    %177 = vector.broadcast %176 : f32 to vector<1x128xf32>
    %178 = arith.mulf %177, %155 : vector<1x128xf32>
    %179 = arith.addf %175, %178 : vector<1x128xf32>
    %c34 = arith.constant 34 : index
    %180 = memref.load %arg1[%c34] : memref<36xf32, #tpu.memory_space<smem>>
    %181 = vector.broadcast %180 : f32 to vector<1x128xf32>
    %182 = arith.mulf %181, %158 : vector<1x128xf32>
    %183 = arith.addf %179, %182 : vector<1x128xf32>
    %c10_27 = arith.constant 10 : index
    %184 = memref.load %arg2[%c10_27] : memref<12xf32, #tpu.memory_space<smem>>
    %185 = vector.broadcast %184 : f32 to vector<1x128xf32>
    %186 = arith.addf %183, %185 : vector<1x128xf32>
    %c29 = arith.constant 29 : index
    %187 = memref.load %arg1[%c29] : memref<36xf32, #tpu.memory_space<smem>>
    %188 = vector.broadcast %187 : f32 to vector<1x128xf32>
    %189 = arith.mulf %188, %152 : vector<1x128xf32>
    %c32 = arith.constant 32 : index
    %190 = memref.load %arg1[%c32] : memref<36xf32, #tpu.memory_space<smem>>
    %191 = vector.broadcast %190 : f32 to vector<1x128xf32>
    %192 = arith.mulf %191, %155 : vector<1x128xf32>
    %193 = arith.addf %189, %192 : vector<1x128xf32>
    %c35 = arith.constant 35 : index
    %194 = memref.load %arg1[%c35] : memref<36xf32, #tpu.memory_space<smem>>
    %195 = vector.broadcast %194 : f32 to vector<1x128xf32>
    %196 = arith.mulf %195, %158 : vector<1x128xf32>
    %197 = arith.addf %193, %196 : vector<1x128xf32>
    %c11_28 = arith.constant 11 : index
    %198 = memref.load %arg2[%c11_28] : memref<12xf32, #tpu.memory_space<smem>>
    %199 = vector.broadcast %198 : f32 to vector<1x128xf32>
    %200 = arith.addf %197, %199 : vector<1x128xf32>
    %c0_29 = arith.constant 0 : index
    %c0_30 = arith.constant 0 : index
    %c0_31 = arith.constant 0 : index
    %201 = vector.load %arg4[%c0_29, %c0_30, %c0_31] : memref<3x1x128xf32, #tpu.memory_space<vmem>>, vector<1x1x128xf32>
    %202 = vector.shape_cast %201 : vector<1x1x128xf32> to vector<1x128xf32>
    %203 = vector.shape_cast %172 : vector<1x128xf32> to vector<1x1x128xf32>
    tpu.vector_store %arg4[%c0_29, %c0_30, %c0_31], %203 {strides = array<i32>} : memref<3x1x128xf32, #tpu.memory_space<vmem>>, vector<1x1x128xf32>,
    %c1_32 = arith.constant 1 : index
    %c0_33 = arith.constant 0 : index
    %c0_34 = arith.constant 0 : index
    %204 = vector.load %arg4[%c1_32, %c0_33, %c0_34] : memref<3x1x128xf32, #tpu.memory_space<vmem>>, vector<1x1x128xf32>
    %205 = vector.shape_cast %204 : vector<1x1x128xf32> to vector<1x128xf32>
    %206 = vector.shape_cast %186 : vector<1x128xf32> to vector<1x1x128xf32>
    tpu.vector_store %arg4[%c1_32, %c0_33, %c0_34], %206 {strides = array<i32>} : memref<3x1x128xf32, #tpu.memory_space<vmem>>, vector<1x1x128xf32>,
    %c2_35 = arith.constant 2 : index
    %c0_36 = arith.constant 0 : index
    %c0_37 = arith.constant 0 : index
    %207 = vector.load %arg4[%c2_35, %c0_36, %c0_37] : memref<3x1x128xf32, #tpu.memory_space<vmem>>, vector<1x1x128xf32>
    %208 = vector.shape_cast %207 : vector<1x1x128xf32> to vector<1x128xf32>
    %209 = vector.shape_cast %200 : vector<1x128xf32> to vector<1x1x128xf32>
    tpu.vector_store %arg4[%c2_35, %c0_36, %c0_37], %209 {strides = array<i32>} : memref<3x1x128xf32, #tpu.memory_space<vmem>>, vector<1x1x128xf32>,
    return
  }
  func.func @transform_0(%arg0: i32) -> i32 {
    %c0_i32 = arith.constant 0 : i32
    %c0_i32_0 = arith.constant 0 : i32
    return %c0_i32 : i32
  }
  func.func @transform_1(%arg0: i32) -> i32 {
    %c0_i32 = arith.constant 0 : i32
    %c0_i32_0 = arith.constant 0 : i32
    return %c0_i32 : i32
  }
  func.func @transform_2(%arg0: i32) -> (i32, i32, i32) {
    %c0_i32 = arith.constant 0 : i32
    %c0_i32_0 = arith.constant 0 : i32
    %c0_i32_1 = arith.constant 0 : i32
    return %c0_i32, %arg0, %c0_i32_0 : i32, i32, i32
  }
  func.func @transform_3(%arg0: i32) -> (i32, i32, i32) {
    %c0_i32 = arith.constant 0 : i32
    %c0_i32_0 = arith.constant 0 : i32
    %c0_i32_1 = arith.constant 0 : i32
    return %c0_i32, %arg0, %c0_i32_0 : i32, i32, i32
  }
}

</mosaic_0001>

<bundles_post_ra>
// kernel: inn_forward.1
= control target key start
LH: loop header
LB: loop body
LE: loop exit
PB: predicated region body
PF: predicated region fallthrough
CT: control target
= control target key end

     0   :  { %8 = vsyncpa [#allocation3], 0  ;;  %s487_s0 = inlined_call_operand.vmem [shape: f32[36], index: 0, kind: input, shape index: {}]   ;;  %s488_s1 = inlined_call_operand.vmem [shape: f32[12], index: 1, kind: input, shape index: {}]   ;;  %s489_s2 = inlined_call_operand.vmem [shape: f32[3,1,128], index: 2, kind: input, shape index: {}]   ;;  %s490_s3 = inlined_call_operand.vmem [shape: f32[3,1,128], index: 3, kind: output, shape index: {}]  }
   0x1   :  { %s16_s14 = sshll.u32 %s487_s0, 4  ;;  %s17_s14 = int_to_ptr.vmem [resolvable:$true] %s16_s14 }
   0x2   :  { %9 = vsyncpa [#allocation5], 0  ;;  %s26_s17 = sshll.u32 %s488_s1, 4  ;;  %s293_s18 = scalar_lea.vmem %s17_s14, 16  ;;  %s27_s17 = int_to_ptr.vmem [resolvable:$true] %s26_s17 }
   0x3   :  { %p294_p0 = scmp.ne.s32.totalorder %s17_s14, %s293_s18  ;;  %p298_p1 = scmp.lt.s32.totalorder %s17_s14, %s17_s14 }
   0x4   :  { %p299_p2 = scmp.lt.s32.totalorder %s293_s18, %s293_s18 }
   0x6   :  { %p300_p3 = por %p299_p2, %p298_p1 }
   0x8   :  { %p301_p4 = pnand %p300_p3, %p294_p0 }
   0xa   :  { %304 = shalt.err (!%p301_p4)
}
   0xb   :  { %s321_s19 = smov [#allocation2]   ;;  %s305_s20 = scalar_lea.vmem %s27_s17, 16 }
   0xc   :  { %19 = dma.vmem_to_smem %s17_s14, 16, %s321_s19, [#allocation3]  }
   0xd   :  { %p306_p5 = scmp.ne.s32.totalorder %s27_s17, %s305_s20  ;;  %p310_p6 = scmp.lt.s32.totalorder %s27_s17, %s27_s17 }
   0xe   :  { %p311_p7 = scmp.lt.s32.totalorder %s305_s20, %s305_s20 }
  0x10   :  { %p312_p8 = por %p311_p7, %p310_p6 }
  0x12   :  { %p313_p9 = pnand %p312_p8, %p306_p5 }
  0x14   :  { %316 = shalt.err (!%p313_p9)
}
  0x15   :  { %s322_s0 = smov [#allocation4]  }
  0x16   :  { %29 = dma.vmem_to_smem %s27_s17, 16, %s322_s0, [#allocation5]  }
  0x17   :  { %317 = dma.done.wait [#allocation3], 16  }
  0x18   :  { %318 = vsyncadd [#allocation3], 4294967280 }
  0x19   :  { %319 = dma.done.wait [#allocation5], 16  }
  0x1a   :  { %320 = vsyncadd [#allocation5], 4294967280 }
  0x1b   :  { %38 = sfence }
  0x1c   :  { %s44_s1 = sld [smem:[#allocation2]]  ;;  %s243_s21 = sld [smem:[#allocation2 + $0x3]]  ;;  %v39_v0 = vld [vmem:[%s489_s2] sm:$0x1]  ;;  %v241_v1 = vld [vmem:[%s489_s2 + $0x1] sm:$0x1] }
  0x1d   :  { %s244_s22 = sld [smem:[#allocation2 + $0x6]]  ;;  %s349_s23 = sld [smem:[#allocation4]]  ;;  %v242_v2 = vld [vmem:[%s489_s2 + $0x2] sm:$0x1] }
  0x1e   :  { %s245_s24 = sld [smem:[#allocation2 + $0x1]]  ;;  %s246_s25 = sld [smem:[#allocation2 + $0x4]] }
  0x1f   :  { %s247_s28 = sld [smem:[#allocation2 + $0x7]]  ;;  %s354_s29 = sld [smem:[#allocation4 + $0x1]] }
  0x20   :  { %s249_s5 = sld [smem:[#allocation2 + $0x2]]  ;;  %s250_s6 = sld [smem:[#allocation2 + $0x5]] }
  0x21   :  { %s362_s9 = sld [smem:[#allocation2 + $0x8]]  ;;  %s364_s10 = sld [smem:[#allocation4 + $0x2]] }
  0x22   :  { %v45_v3 = vstv %s44_s1  ;;  %v48_v4 = vstv %s243_s21  ;;  %s366_s11 = sld [smem:[#allocation2 + $0x9]]  ;;  %s368_s12 = sld [smem:[#allocation2 + $0xa]] }
  0x23   :  { %v46_v5 = vmul.f32 %v45_v3, %v39_v0  ;;  %v49_v6 = vmul.f32 %v241_v1, %v48_v4  ;;  %v52_v7 = vstv %s244_s22  ;;  %s370_s2 = sld [smem:[#allocation2 + $0xc]]  ;;  %s372_s13 = sld [smem:[#allocation2 + $0xd]]  ;;  %v56_v15 = vstv %s349_s23 }
  0x24   :  { %v53_v8 = vmul.f32 %v242_v2, %v52_v7  ;;  %v59_v9 = vstv %s245_s24  ;;  %v62_v10 = vstv %s246_s25  ;;  %s375_s14 = sld [smem:[#allocation2 + $0xb]]  ;;  %s377_s15 = sld [smem:[#allocation2 + $0xe]] }
  0x25   :  { %v50_v11 = vadd.f32 %v49_v6, %v46_v5  ;;  %v60_v12 = vmul.f32 %v59_v9, %v39_v0  ;;  %v63_v13 = vmul.f32 %v241_v1, %v62_v10  ;;  %v66_v14 = vstv %s247_s28  ;;  %s379_s16 = sld [smem:[#allocation2 + $0xf]]  ;;  %s383_s17 = sld [smem:[#allocation2 + $0x10]] }
  0x26   :  { %v67_v16 = vmul.f32 %v242_v2, %v66_v14  ;;  %v73_v17 = vstv %s249_s5  ;;  %v76_v18 = vstv %s250_s6  ;;  %v70_v23 = vstv %s354_s29  ;;  %s385_s18 = sld [smem:[#allocation2 + $0x11]]  ;;  %s389_s19 = sld [smem:[#allocation4 + $0x3]] }
  0x27   :  { %v54_v19 = vadd.f32 %v53_v8, %v50_v11  ;;  %v64_v20 = vadd.f32 %v63_v13, %v60_v12  ;;  %v74_v21 = vmul.f32 %v73_v17, %v39_v0  ;;  %v77_v22 = vmul.f32 %v241_v1, %v76_v18  ;;  %s392_s20 = sld [smem:[#allocation4 + $0x4]]  ;;  %s395_s0 = sld [smem:[#allocation4 + $0x5]] }
  0x28   :  { %v80_v24 = vstv %s362_s9  ;;  %v84_v29 = vstv %s364_s10  ;;  %v93_v33 = vstv %s366_s11  ;;  %v107_v34 = vstv %s368_s12  ;;  %s403_s1 = sld [smem:[#allocation2 + $0x12]]  ;;  %s405_s21 = sld [smem:[#allocation2 + $0x15]] }
  0x29   :  { %v57_v25 = vadd.f32 %v56_v15, %v54_v19  ;;  %v68_v26 = vadd.f32 %v67_v16, %v64_v20  ;;  %v78_v27 = vadd.f32 %v77_v22, %v74_v21  ;;  %v81_v28 = vmul.f32 %v242_v2, %v80_v24  ;;  %s407_s22 = sld [smem:[#allocation2 + $0x18]]  ;;  %s409_s23 = sld [smem:[#allocation2 + $0x13]] }
  0x2a   :  { %v121_v38 = vstv %s375_s14  ;;  %v96_v39 = vstv %s370_s2  ;;  %v110_v40 = vstv %s372_s13  ;;  %v124_v41 = vstv %s377_s15  ;;  %s411_s24 = sld [smem:[#allocation2 + $0x16]]  ;;  %s413_s25 = sld [smem:[#allocation2 + $0x19]] }
  0x2b   :  { %v71_v30 = vadd.f32 %v70_v23, %v68_v26  ;;  %v82_v31 = vadd.f32 %v81_v28, %v78_v27  ;;  %v86_v32 = vmul.f32 0.03, %v57_v25  ;;  %v100_v46 = vstv %s379_s16  ;;  %s415_s26 = sld [smem:[#allocation2 + $0x14]]  ;;  %s417_s27 = sld [smem:[#allocation2 + $0x17]] }
  0x2c   :  { %v114_v47 = vstv %s383_s17  ;;  %v128_v49 = vstv %s385_s18  ;;  %v104_v58 = vstv %s389_s19  ;;  %s421_s28 = sld [smem:[#allocation2 + $0x1a]]  ;;  %s425_s29 = sld [smem:[#allocation4 + $0x6]] }
  0x2d   :  { %v85_v35 = vadd.f32 %v84_v29, %v82_v31  ;;  %v87_v36 = vmax.f32 %v57_v25, %v86_v32  ;;  %v88_v37 = vmul.f32 0.03, %v71_v30  ;;  %v118_v59 = vstv %s392_s20  ;;  %s427_s30 = sld [smem:[#allocation4 + $0x7]]  ;;  %s431_s4 = sld [smem:[#allocation4 + $0x8]] }
  0x2e   :  { %v132_v0 = vstv %s395_s0  ;;  %v141_v5 = vstv %s403_s1  ;;  %v144_v8 = vstv %s405_s21  ;;  %s439_s5 = sld [smem:[#allocation2 + $0x1b]]  ;;  %s441_s6 = sld [smem:[#allocation2 + $0x1e]] }
  0x2f   :  { %v89_v42 = vmax.f32 %v71_v30, %v88_v37  ;;  %v90_v43 = vmul.f32 0.03, %v85_v35  ;;  %v94_v44 = vmul.f32 %v93_v33, %v87_v36  ;;  %v108_v45 = vmul.f32 %v107_v34, %v87_v36  ;;  %s443_s7 = sld [smem:[#allocation2 + $0x21]]  ;;  %s445_s8 = sld [smem:[#allocation2 + $0x1c]] }
  0x30   :  { %v122_v48 = vmul.f32 %v121_v38, %v87_v36  ;;  %v148_v9 = vstv %s407_s22  ;;  %v155_v11 = vstv %s409_s23  ;;  %v158_v12 = vstv %s411_s24  ;;  %s447_s9 = sld [smem:[#allocation2 + $0x1f]]  ;;  %s449_s10 = sld [smem:[#allocation2 + $0x22]] }
  0x31   :  { %v91_v50 = vmax.f32 %v85_v35, %v90_v43  ;;  %v97_v51 = vmul.f32 %v96_v39, %v89_v42  ;;  %v111_v52 = vmul.f32 %v110_v40, %v89_v42  ;;  %v125_v53 = vmul.f32 %v124_v41, %v89_v42  ;;  %s451_s11 = sld [smem:[#allocation2 + $0x1d]]  ;;  %s453_s12 = sld [smem:[#allocation2 + $0x20]] }
  0x32   :  { %v162_v13 = vstv %s413_s25  ;;  %v169_v16 = vstv %s415_s26  ;;  %v172_v17 = vstv %s417_s27  ;;  %v176_v19 = vstv %s421_s28  ;;  %s457_s2 = sld [smem:[#allocation2 + $0x23]]  ;;  %s461_s13 = sld [smem:[#allocation4 + $0x9]] }
  0x33   :  { %v98_v54 = vadd.f32 %v97_v51, %v94_v44  ;;  %v101_v55 = vmul.f32 %v100_v46, %v91_v50  ;;  %v112_v56 = vadd.f32 %v111_v52, %v108_v45  ;;  %v115_v57 = vmul.f32 %v114_v47, %v91_v50  ;;  %s463_s14 = sld [smem:[#allocation4 + $0xa]]  ;;  %s467_s15 = sld [smem:[#allocation4 + $0xb]] }
  0x34   :  { %v126_v60 = vadd.f32 %v125_v53, %v122_v48  ;;  %v129_v61 = vmul.f32 %v128_v49, %v91_v50  ;;  %v152_v31 = vstv %s425_s29  ;;  %v166_v32 = vstv %s427_s30 }
  0x35   :  { %v102_v62 = vadd.f32 %v101_v55, %v98_v54  ;;  %v116_v63 = vadd.f32 %v115_v57, %v112_v56  ;;  %v180_v36 = vstv %s431_s4  ;;  %v189_v41 = vstv %s439_s5 }
  0x36   :  { %v130_v1 = vadd.f32 %v129_v61, %v126_v60  ;;  %v192_v44 = vstv %s441_s6  ;;  %v196_v45 = vstv %s443_s7  ;;  %v203_v47 = vstv %s445_s8 }
  0x37   :  { %v105_v2 = vadd.f32 %v104_v58, %v102_v62  ;;  %v119_v3 = vadd.f32 %v118_v59, %v116_v63  ;;  %v206_v48 = vstv %s447_s9  ;;  %v210_v49 = vstv %s449_s10 }
  0x38   :  { %v133_v4 = vadd.f32 %v132_v0, %v130_v1  ;;  %v217_v52 = vstv %s451_s11  ;;  %v220_v53 = vstv %s453_s12  ;;  %v224_v55 = vstv %s457_s2 }
  0x39   :  { %v134_v6 = vmul.f32 0.03, %v105_v2  ;;  %v136_v7 = vmul.f32 0.03, %v119_v3 }
  0x3a   :  { %v138_v10 = vmul.f32 0.03, %v133_v4 }
  0x3b   :  { %v135_v14 = vmax.f32 %v105_v2, %v134_v6  ;;  %v137_v15 = vmax.f32 %v119_v3, %v136_v7  ;;  %v200_v3 = vstv %s461_s13 }
  0x3c   :  { %v139_v18 = vmax.f32 %v133_v4, %v138_v10  ;;  %v214_v4 = vstv %s463_s14 }
  0x3d   :  { %v142_v20 = vmul.f32 %v141_v5, %v135_v14  ;;  %v145_v21 = vmul.f32 %v144_v8, %v137_v15  ;;  %v156_v22 = vmul.f32 %v155_v11, %v135_v14  ;;  %v159_v23 = vmul.f32 %v158_v12, %v137_v15 }
  0x3e   :  { %v149_v24 = vmul.f32 %v148_v9, %v139_v18  ;;  %v163_v25 = vmul.f32 %v162_v13, %v139_v18  ;;  %v170_v26 = vmul.f32 %v169_v16, %v135_v14  ;;  %v173_v27 = vmul.f32 %v172_v17, %v137_v15 }
  0x3f   :  { %v146_v28 = vadd.f32 %v145_v21, %v142_v20  ;;  %v160_v29 = vadd.f32 %v159_v23, %v156_v22  ;;  %v177_v30 = vmul.f32 %v176_v19, %v139_v18  ;;  %v228_v8 = vstv %s467_s15 }
  0x40   :  { %v174_v33 = vadd.f32 %v173_v27, %v170_v26 }
  0x41   :  { %v150_v34 = vadd.f32 %v149_v24, %v146_v28  ;;  %v164_v35 = vadd.f32 %v163_v25, %v160_v29 }
  0x42   :  { %v178_v37 = vadd.f32 %v177_v30, %v174_v33 }
  0x43   :  { %v153_v38 = vadd.f32 %v152_v31, %v150_v34  ;;  %v167_v39 = vadd.f32 %v166_v32, %v164_v35 }
  0x44   :  { %v181_v40 = vadd.f32 %v180_v36, %v178_v37 }
  0x45   :  { %v182_v42 = vmul.f32 0.03, %v153_v38  ;;  %v184_v43 = vmul.f32 0.03, %v167_v39 }
  0x46   :  { %v186_v46 = vmul.f32 0.03, %v181_v40 }
  0x47   :  { %v183_v50 = vmax.f32 %v153_v38, %v182_v42  ;;  %v185_v51 = vmax.f32 %v167_v39, %v184_v43 }
  0x48   :  { %v187_v54 = vmax.f32 %v181_v40, %v186_v46 }
  0x49   :  { %v190_v56 = vmul.f32 %v189_v41, %v183_v50  ;;  %v193_v57 = vmul.f32 %v192_v44, %v185_v51  ;;  %v204_v58 = vmul.f32 %v203_v47, %v183_v50  ;;  %v207_v59 = vmul.f32 %v206_v48, %v185_v51 }
  0x4a   :  { %v197_v60 = vmul.f32 %v196_v45, %v187_v54  ;;  %v211_v61 = vmul.f32 %v210_v49, %v187_v54  ;;  %v218_v62 = vmul.f32 %v217_v52, %v183_v50  ;;  %v221_v63 = vmul.f32 %v220_v53, %v185_v51 }
  0x4b   :  { %v194_v0 = vadd.f32 %v193_v57, %v190_v56  ;;  %v208_v1 = vadd.f32 %v207_v59, %v204_v58  ;;  %v225_v2 = vmul.f32 %v224_v55, %v187_v54 }
  0x4c   :  { %v222_v5 = vadd.f32 %v221_v63, %v218_v62 }
  0x4d   :  { %v198_v6 = vadd.f32 %v197_v60, %v194_v0  ;;  %v212_v7 = vadd.f32 %v211_v61, %v208_v1 }
  0x4e   :  { %v226_v9 = vadd.f32 %v225_v2, %v222_v5 }
  0x4f   :  { %v201_v10 = vadd.f32 %v200_v3, %v198_v6  ;;  %v215_v11 = vadd.f32 %v214_v4, %v212_v7 }
  0x50   :  { %v229_v12 = vadd.f32 %v228_v8, %v226_v9 }
  0x51   :  { %230 = vst [vmem:[%s490_s3] sm:$0x1] %v201_v10  ;;  %289 = vst [vmem:[%s490_s3 + $0x1] sm:$0x1] %v215_v11 }
  0x52   :  { %290 = vst [vmem:[%s490_s3 + $0x2] sm:$0x1] %v229_v12 }
  0x53   :  { %239 = vsyncpa [#allocation3], 1 }
  0x54   :  { %240 = vsyncpa [#allocation5], 1 }

</bundles_post_ra>
